<compile_context>
chip_gen: v7x
topology: tpu7x:2x2x1
jax: 0.10.0
libtpu: 0.0.40
codegen_flags: <defaults>
</compile_context>

<pallas_src>
import jax
import jax.numpy as jnp
from jax.experimental import pallas as pl
from jax.experimental.pallas import tpu as pltpu


# ---------------------------------------------------------------------------
# Tile pickers
# ---------------------------------------------------------------------------
def _round_up(x, m):
    return ((x + m - 1) // m) * m


def _pick_lane_tile(total_padded, cout_g):
    """Largest 128-multiple divisor of the padded lane extent, capped so the f32
    accumulator (Cout_g x TL) stays inside half the vreg file (v5e store-slot /
    spill concern) and blocks stay small for v7x's 64 MiB VMEM."""
    cap = max(128, min(512, ((128 * 1024) // (4 * max(cout_g, 1))) // 128 * 128))
    best, t = 0, 128
    while t <= min(total_padded, cap):
        if total_padded % t == 0:
            best = t
        t += 128
    return best if best else total_padded


def _pick_row_tile(total, target=256):
    for step in (16, 8):                    # prefer bf16-friendly sublane multiples
        best, t = 0, step
        while t <= min(total, target):
            if total % t == 0:
                best = t
            t += step
        if best:
            return best
    return total


# ---------------------------------------------------------------------------
# Kernel B: fused BN (precomputed per-row scale/shift) + SiLU, elementwise
# ---------------------------------------------------------------------------
def _bn_silu_kernel(y_ref, scale_ref, shift_ref, o_ref):
    # y_ref: (TR, TL) bf16; scale/shift: (TR, 1) f32; o_ref: (TR, TL) f32
    z = y_ref[...].astype(jnp.float32) * scale_ref[...] + shift_ref[...]
    # exp -> EUP, approx reciprocal -> EUP; this pass is DMA-bound either way.
    sig = pl.reciprocal(1.0 + jnp.exp(-z), approx=True)
    o_ref[...] = (z * sig).astype(o_ref.dtype)


# ---------------------------------------------------------------------------
# Wrapper
# ---------------------------------------------------------------------------
def cnn_block_forward(x_nchw, w_oihw, bias, gamma, beta, *,
                      stride, padding, groups, eps=1e-5,
                      mxu_dtype=jnp.bfloat16):
    N, Cin, H, W = x_nchw.shape
    Cout, Cin_g, KH, KW = w_oihw.shape
    assert Cin % groups == 0 and Cout % groups == 0 and Cin_g == Cin // groups
    Cout_g = Cout // groups
    OH = (H + 2 * padding - KH) // stride + 1
    OW = (W + 2 * padding - KW) // stride + 1
    P = OH * OW                        # true spatial positions per image (lane axis)
    P_pad = _round_up(P, 128)          # lane-dense padded extent
    K = Cin_g * KH * KW                # contraction length per group
    M_total = N * P                    # BN reduction count per channel (true count)

    TL = _pick_lane_tile(P_pad, Cout_g)
    n_p = P_pad // TL
    needs_mask = (P_pad != P)

    # ---- glue: padded-input tap gather -> patches^T [N, groups, K, P_pad] ----
    # TODO(synk): this still writes/reads KH*KW x input bytes (bf16) through HBM.
    xp = jnp.pad(x_nchw, ((0, 0), (0, 0), (padding, padding), (padding, padding)))
    taps = []
    for kh in range(KH):
        for kw in range(KW):
            taps.append(xp[:, :, kh:kh + stride * OH:stride,
                           kw:kw + stride * OW:stride])      # (N, Cin, OH, OW)
    pt = jnp.stack(taps, axis=2)                              # (N, Cin, KH*KW, OH, OW)
    pt = pt.reshape(N, groups, K, P).astype(mxu_dtype)        # k = (ci, kh, kw)
    if needs_mask:
        pt = jnp.pad(pt, ((0, 0), (0, 0), (0, 0), (0, P_pad - P)))

    # weight [Cout, Cin_g, KH, KW] -> [groups, Cout_g, K] with matching k order
    wg = w_oihw.reshape(groups, Cout_g, K).astype(mxu_dtype)
    bg = bias.reshape(groups, Cout_g, 1).astype(jnp.float32)

    # ---- Kernel A: conv (+bias) with fused, p-accumulated BN partial stats ----
    def conv_stats_kernel(a_ref, w_ref, b_ref, y_ref, s1_ref, s2_ref):
        # a_ref : (1, 1, K, TL)       im2col^T tile (bf16)
        # w_ref : (1, Cout_g, K)      group weights (bf16)
        # b_ref : (1, Cout_g, 1)      conv bias (f32)
        # y_ref : (1, 1, Cout_g, TL)  conv output tile (bf16), lane-dense
        # s1/s2 : (1, 1, Cout_g, 1)   per-(n,g) BN partials, resident across p
        p = pl.program_id(2)
        acc = jnp.dot(w_ref[0], a_ref[0, 0], preferred_element_type=jnp.float32)
        acc = acc + b_ref[0]                                   # (Cout_g, TL) f32
        y_ref[0, 0] = acc.astype(y_ref.dtype)                  # bf16 writeback

        if needs_mask:   # padded lanes hold `bias`; keep them out of the stats
            lane = jax.lax.broadcasted_iota(jnp.int32, acc.shape, 1) + p * TL
            acc_m = jnp.where(lane < P, acc, 0.0)
        else:
            acc_m = acc

        @pl.when(p == 0)
        def _():
            s1_ref[...] = jnp.zeros_like(s1_ref)
            s2_ref[...] = jnp.zeros_like(s2_ref)

        s1_ref[0, 0] += jnp.sum(acc_m, axis=1, keepdims=True)          # (Cout_g, 1)
        s2_ref[0, 0] += jnp.sum(acc_m * acc_m, axis=1, keepdims=True)  # (Cout_g, 1)

    bytes_a = (N * groups * K * P_pad * 2 + groups * Cout_g * K * 2
               + groups * Cout_g * 4 + N * Cout * P_pad * 2 + 2 * N * Cout * 4)
    cost_a = pl.CostEstimate(flops=2 * N * Cout * K * P_pad,
                             transcendentals=0, bytes_accessed=bytes_a)

    y, ps1, ps2 = pl.pallas_call(
        conv_stats_kernel,
        out_shape=(
            jax.ShapeDtypeStruct((N, groups, Cout_g, P_pad), mxu_dtype),
            jax.ShapeDtypeStruct((N, groups, Cout_g, 1), jnp.float32),
            jax.ShapeDtypeStruct((N, groups, Cout_g, 1), jnp.float32),
        ),
        grid_spec=pltpu.PrefetchScalarGridSpec(
            num_scalar_prefetch=0,
            grid=(groups, N, n_p),          # weights resident across N and p
            in_specs=[
                pl.BlockSpec((1, 1, K, TL), lambda g, n, p: (n, g, 0, p)),
                pl.BlockSpec((1, Cout_g, K), lambda g, n, p: (g, 0, 0)),
                pl.BlockSpec((1, Cout_g, 1), lambda g, n, p: (g, 0, 0)),
            ],
            out_specs=(
                pl.BlockSpec((1, 1, Cout_g, TL), lambda g, n, p: (n, g, 0, p)),
                pl.BlockSpec((1, 1, Cout_g, 1), lambda g, n, p: (n, g, 0, 0)),
                pl.BlockSpec((1, 1, Cout_g, 1), lambda g, n, p: (n, g, 0, 0)),
            ),
        ),
        compiler_params=pltpu.CompilerParams(
            dimension_semantics=("parallel", "parallel", "arbitrary")),
        cost_estimate=cost_a,
    )(pt, wg, bg)

    # ---- tiny O(Cout) finalize in plain JAX: mean/rstd -> scale/shift ----
    sum1 = jnp.sum(ps1, axis=0)[..., 0]                    # (groups, Cout_g)
    sum2 = jnp.sum(ps2, axis=0)[..., 0]
    mean = sum1 / M_total
    var = jnp.maximum(sum2 / M_total - mean * mean, 0.0)   # clamp before rsqrt
    rstd = jax.lax.rsqrt(var + eps)
    g2 = gamma.reshape(groups, Cout_g).astype(jnp.float32)
    b2 = beta.reshape(groups, Cout_g).astype(jnp.float32)
    scale_c = (g2 * rstd).reshape(Cout)                    # per-channel scale
    shift_c = (b2 - mean * g2 * rstd).reshape(Cout)        # per-channel shift

    # ---- Kernel B: BN affine + SiLU on a collapsed (N*Cout, P_pad) view ----
    R = N * Cout
    TR = _pick_row_tile(R)
    y2 = y.reshape(R, P_pad)                               # free collapse (contiguous)
    scale_rows = jnp.broadcast_to(scale_c[None, :], (N, Cout)).reshape(R, 1)
    shift_rows = jnp.broadcast_to(shift_c[None, :], (N, Cout)).reshape(R, 1)

    bytes_b = R * P_pad * 2 + R * P_pad * 4 + 2 * R * 4
    cost_b = pl.CostEstimate(flops=6 * R * P_pad,
                             transcendentals=R * P_pad, bytes_accessed=bytes_b)

    out2 = pl.pallas_call(
        _bn_silu_kernel,
        out_shape=jax.ShapeDtypeStruct((R, P_pad), x_nchw.dtype),
        grid_spec=pltpu.PrefetchScalarGridSpec(
            num_scalar_prefetch=0,
            grid=(R // TR, n_p),
            in_specs=[
                pl.BlockSpec((TR, TL), lambda r, p: (r, p)),
                pl.BlockSpec((TR, 1), lambda r, p: (r, 0)),
                pl.BlockSpec((TR, 1), lambda r, p: (r, 0)),
            ],
            out_specs=pl.BlockSpec((TR, TL), lambda r, p: (r, p)),
        ),
        compiler_params=pltpu.CompilerParams(
            dimension_semantics=("parallel", "parallel")),
        cost_estimate=cost_b,
    )(y2, scale_rows, shift_rows)

    if needs_mask:
        out2 = out2[:, :P]                                 # drop padded lanes
    # (N*Cout, OH*OW) is exactly NCHW flattened -> free reshape, no transpose.
    return out2.reshape(N, Cout, OH, OW)


# ---------------------------------------------------------------------------
# Pure-JAX reference (matches the PyTorch forward in training mode; conv inputs
# rounded to the same bf16 the kernel feeds the MXU, accumulated in f32)
# ---------------------------------------------------------------------------
def ref_forward(x, w, b, gamma, beta, *, stride, padding, groups, eps=1e-5,
                mxu_dtype=jnp.bfloat16):
    y = jax.lax.conv_general_dilated(
        x.astype(mxu_dtype).astype(jnp.float32),
        w.astype(mxu_dtype).astype(jnp.float32),
        window_strides=(stride, stride),
        padding=[(padding, padding), (padding, padding)],
        dimension_numbers=("NCHW", "OIHW", "NCHW"),
        feature_group_count=groups,
        precision=jax.lax.Precision.HIGHEST) + b[None, :, None, None]
    mean = jnp.mean(y, axis=(0, 2, 3), keepdims=True)
    var = jnp.mean((y - mean) ** 2, axis=(0, 2, 3), keepdims=True)
    z = (y - mean) * jax.lax.rsqrt(var + eps)
    z = z * gamma[None, :, None, None] + beta[None, :, None, None]
    return z * jax.nn.sigmoid(z)


if __name__ == "__main__":
    def run_case(name, N, Cin, H, W, Cout, KH, stride, padding, groups, key):
        Cin_g = Cin // groups
        kx, kw, kb = jax.random.split(key, 3)
        x = jax.random.normal(kx, (N, Cin, H, W), dtype=jnp.float32)
        w = jax.random.normal(kw, (Cout, Cin_g, KH, KH), dtype=jnp.float32) * 0.1
        b = jax.random.normal(kb, (Cout,), dtype=jnp.float32) * 0.1
        gamma = jnp.ones((Cout,), dtype=jnp.float32)   # BatchNorm2d weight init
        beta = jnp.zeros((Cout,), dtype=jnp.float32)   # BatchNorm2d bias init

        out = cnn_block_forward(x, w, b, gamma, beta,
                                stride=stride, padding=padding, groups=groups)
        out = jax.block_until_ready(out)

        ref = ref_forward(x, w, b, gamma, beta,
                          stride=stride, padding=padding, groups=groups)
        assert out.shape == ref.shape, (name, out.shape, ref.shape)
        max_err = float(jnp.max(jnp.abs(out - ref)))
        # tolerance covers bf16 MXU inputs + bf16 y intermediate + approx reciprocal
        # versus the pure-f32 reference.
        assert jnp.allclose(out, ref, rtol=3e-2, atol=3e-2), (name, max_err)

    key = jax.random.PRNGKey(0)
    k1, k2 = jax.random.split(key)
    # CNNBlock(in_channels=4, out_channels=8, kernel_size=3, stride=1, padding=1, groups=2)
    run_case("grouped", N=2, Cin=4, H=16, W=16, Cout=8, KH=3,
             stride=1, padding=1, groups=2, key=k1)
    # Depthwise CNNBlock(4, 4, 3, stride=2, padding=1, groups=4): exercises the
    # stride>1 path and the non-128 P (=49) lane-padding / stats-masking path.
    run_case("depthwise", N=2, Cin=4, H=14, W=14, Cout=4, KH=3,
             stride=2, padding=1, groups=4, key=k2)

    print("KERNEL_OK")
</pallas_src>

<mosaic_0001>
module attributes {stable_mosaic.version = 11 : i64} {
  func.func @conv_stats_kernel(%arg0: i32, %arg1: i32, %arg2: i32, %arg3: memref<1x1x18x256xbf16, #tpu.memory_space<vmem>>, %arg4: memref<1x4x18xbf16, #tpu.memory_space<vmem>>, %arg5: memref<1x4x1xf32, #tpu.memory_space<vmem>>, %arg6: memref<1x1x4x256xbf16, #tpu.memory_space<vmem>>, %arg7: memref<1x1x4x1xf32, #tpu.memory_space<vmem>>, %arg8: memref<1x1x4x1xf32, #tpu.memory_space<vmem>>) attributes {dimension_semantics = [#tpu.dimension_semantics<parallel>, #tpu.dimension_semantics<parallel>, #tpu.dimension_semantics<arbitrary>], iteration_bounds = array<i64: 2, 2, 1>, scalar_prefetch = 0 : i64, scratch_operands = 0 : i64, tpu.core_type = #tpu.core_type<tc>, window_params = [{transform_indices = @transform_0, window_bounds = array<i64: 1, 1, 18, 256>}, {transform_indices = @transform_1, window_bounds = array<i64: 1, 4, 18>}, {transform_indices = @transform_2, window_bounds = array<i64: 1, 4, 1>}, {transform_indices = @transform_3, window_bounds = array<i64: 1, 1, 4, 256>}, {transform_indices = @transform_4, window_bounds = array<i64: 1, 1, 4, 1>}, {transform_indices = @transform_5, window_bounds = array<i64: 1, 1, 4, 1>}]} {
    %c0 = arith.constant 0 : index
    %c0_0 = arith.constant 0 : index
    %c0_1 = arith.constant 0 : index
    %0 = vector.load %arg4[%c0, %c0_0, %c0_1] : memref<1x4x18xbf16, #tpu.memory_space<vmem>>, vector<1x4x18xbf16>
    %1 = vector.shape_cast %0 : vector<1x4x18xbf16> to vector<4x18xbf16>
    %c0_2 = arith.constant 0 : index
    %c0_3 = arith.constant 0 : index
    %c0_4 = arith.constant 0 : index
    %c0_5 = arith.constant 0 : index
    %2 = vector.load %arg3[%c0_2, %c0_3, %c0_4, %c0_5] : memref<1x1x18x256xbf16, #tpu.memory_space<vmem>>, vector<1x1x18x256xbf16>
    %3 = vector.shape_cast %2 : vector<1x1x18x256xbf16> to vector<18x256xbf16>
    %cst = arith.constant dense<0.000000e+00> : vector<4x256xf32>
    %4 = tpu.matmul %1, %3, %cst {dimension_numbers = #tpu.dot_dimension_numbers<[1], [0], [0], [1], [0, 0, 1, 1], [], []>} : vector<4x18xbf16>, vector<18x256xbf16>, vector<4x256xf32> -> vector<4x256xf32>
    %c0_6 = arith.constant 0 : index
    %c0_7 = arith.constant 0 : index
    %c0_8 = arith.constant 0 : index
    %5 = vector.load %arg5[%c0_6, %c0_7, %c0_8] : memref<1x4x1xf32, #tpu.memory_space<vmem>>, vector<1x4x1xf32>
    %6 = vector.shape_cast %5 : vector<1x4x1xf32> to vector<4x1xf32>
    %7 = vector.broadcast %6 : vector<4x1xf32> to vector<4x256xf32>
    %8 = arith.addf %4, %7 : vector<4x256xf32>
    %9 = arith.truncf %8 : vector<4x256xf32> to vector<4x256xbf16>
    %c0_9 = arith.constant 0 : index
    %c0_10 = arith.constant 0 : index
    %c0_11 = arith.constant 0 : index
    %c0_12 = arith.constant 0 : index
    %10 = vector.load %arg6[%c0_9, %c0_10, %c0_11, %c0_12] : memref<1x1x4x256xbf16, #tpu.memory_space<vmem>>, vector<1x1x4x256xbf16>
    %11 = vector.shape_cast %10 : vector<1x1x4x256xbf16> to vector<4x256xbf16>
    %12 = vector.shape_cast %9 : vector<4x256xbf16> to vector<1x1x4x256xbf16>
    tpu.vector_store %arg6[%c0_9, %c0_10, %c0_11, %c0_12], %12 {strides = array<i32>} : memref<1x1x4x256xbf16, #tpu.memory_space<vmem>>, vector<1x1x4x256xbf16>,
    %c0_i32 = arith.constant 0 : i32
    %13 = arith.cmpi eq, %arg2, %c0_i32 : i32
    %14 = arith.extui %13 : i1 to i32
    %c0_i32_13 = arith.constant 0 : i32
    %15 = arith.cmpi ne, %14, %c0_i32_13 : i32
    scf.if %15 {
      %cst_32 = arith.constant 0.000000e+00 : f32
      %33 = vector.broadcast %cst_32 : f32 to vector<1x1x4x1xf32>
      %c0_33 = arith.constant 0 : index
      %c0_34 = arith.constant 0 : index
      %c0_35 = arith.constant 0 : index
      %c0_36 = arith.constant 0 : index
      %34 = vector.load %arg7[%c0_33, %c0_34, %c0_35, %c0_36] : memref<1x1x4x1xf32, #tpu.memory_space<vmem>>, vector<1x1x4x1xf32>
      tpu.vector_store %arg7[%c0_33, %c0_34, %c0_35, %c0_36], %33 {strides = array<i32>} : memref<1x1x4x1xf32, #tpu.memory_space<vmem>>, vector<1x1x4x1xf32>,
      %cst_37 = arith.constant 0.000000e+00 : f32
      %35 = vector.broadcast %cst_37 : f32 to vector<1x1x4x1xf32>
      %c0_38 = arith.constant 0 : index
      %c0_39 = arith.constant 0 : index
      %c0_40 = arith.constant 0 : index
      %c0_41 = arith.constant 0 : index
      %36 = vector.load %arg8[%c0_38, %c0_39, %c0_40, %c0_41] : memref<1x1x4x1xf32, #tpu.memory_space<vmem>>, vector<1x1x4x1xf32>
      tpu.vector_store %arg8[%c0_38, %c0_39, %c0_40, %c0_41], %35 {strides = array<i32>} : memref<1x1x4x1xf32, #tpu.memory_space<vmem>>, vector<1x1x4x1xf32>,
    } else {
    }
    %c0_14 = arith.constant 0 : index
    %c0_15 = arith.constant 0 : index
    %c0_16 = arith.constant 0 : index
    %c0_17 = arith.constant 0 : index
    %16 = vector.load %arg7[%c0_14, %c0_15, %c0_16, %c0_17] : memref<1x1x4x1xf32, #tpu.memory_space<vmem>>, vector<1x1x4x1xf32>
    %17 = vector.shape_cast %16 : vector<1x1x4x1xf32> to vector<4x1xf32>
    %cst_18 = arith.constant dense<0.000000e+00> : vector<4xf32>
    %18 = vector.multi_reduction <add>, %8, %cst_18 [1] : vector<4x256xf32> to vector<4xf32>
    %19 = vector.shape_cast %18 : vector<4xf32> to vector<4x1xf32>
    %20 = arith.addf %17, %19 : vector<4x1xf32>
    %c0_19 = arith.constant 0 : index
    %c0_20 = arith.constant 0 : index
    %c0_21 = arith.constant 0 : index
    %c0_22 = arith.constant 0 : index
    %21 = vector.load %arg7[%c0_19, %c0_20, %c0_21, %c0_22] : memref<1x1x4x1xf32, #tpu.memory_space<vmem>>, vector<1x1x4x1xf32>
    %22 = vector.shape_cast %21 : vector<1x1x4x1xf32> to vector<4x1xf32>
    %23 = vector.shape_cast %20 : vector<4x1xf32> to vector<1x1x4x1xf32>
    tpu.vector_store %arg7[%c0_19, %c0_20, %c0_21, %c0_22], %23 {strides = array<i32>} : memref<1x1x4x1xf32, #tpu.memory_space<vmem>>, vector<1x1x4x1xf32>,
    %c0_23 = arith.constant 0 : index
    %c0_24 = arith.constant 0 : index
    %c0_25 = arith.constant 0 : index
    %c0_26 = arith.constant 0 : index
    %24 = vector.load %arg8[%c0_23, %c0_24, %c0_25, %c0_26] : memref<1x1x4x1xf32, #tpu.memory_space<vmem>>, vector<1x1x4x1xf32>
    %25 = vector.shape_cast %24 : vector<1x1x4x1xf32> to vector<4x1xf32>
    %26 = arith.mulf %8, %8 : vector<4x256xf32>
    %cst_27 = arith.constant dense<0.000000e+00> : vector<4xf32>
    %27 = vector.multi_reduction <add>, %26, %cst_27 [1] : vector<4x256xf32> to vector<4xf32>
    %28 = vector.shape_cast %27 : vector<4xf32> to vector<4x1xf32>
    %29 = arith.addf %25, %28 : vector<4x1xf32>
    %c0_28 = arith.constant 0 : index
    %c0_29 = arith.constant 0 : index
    %c0_30 = arith.constant 0 : index
    %c0_31 = arith.constant 0 : index
    %30 = vector.load %arg8[%c0_28, %c0_29, %c0_30, %c0_31] : memref<1x1x4x1xf32, #tpu.memory_space<vmem>>, vector<1x1x4x1xf32>
    %31 = vector.shape_cast %30 : vector<1x1x4x1xf32> to vector<4x1xf32>
    %32 = vector.shape_cast %29 : vector<4x1xf32> to vector<1x1x4x1xf32>
    tpu.vector_store %arg8[%c0_28, %c0_29, %c0_30, %c0_31], %32 {strides = array<i32>} : memref<1x1x4x1xf32, #tpu.memory_space<vmem>>, vector<1x1x4x1xf32>,
    return
  }
  func.func @transform_0(%arg0: i32, %arg1: i32, %arg2: i32) -> (i32, i32, i32, i32) {
    %c0_i32 = arith.constant 0 : i32
    %c0_i32_0 = arith.constant 0 : i32
    return %arg1, %arg0, %c0_i32, %arg2 : i32, i32, i32, i32
  }
  func.func @transform_1(%arg0: i32, %arg1: i32, %arg2: i32) -> (i32, i32, i32) {
    %c0_i32 = arith.constant 0 : i32
    %c0_i32_0 = arith.constant 0 : i32
    %c0_i32_1 = arith.constant 0 : i32
    return %arg0, %c0_i32, %c0_i32_0 : i32, i32, i32
  }
  func.func @transform_2(%arg0: i32, %arg1: i32, %arg2: i32) -> (i32, i32, i32) {
    %c0_i32 = arith.constant 0 : i32
    %c0_i32_0 = arith.constant 0 : i32
    %c0_i32_1 = arith.constant 0 : i32
    return %arg0, %c0_i32, %c0_i32_0 : i32, i32, i32
  }
  func.func @transform_3(%arg0: i32, %arg1: i32, %arg2: i32) -> (i32, i32, i32, i32) {
    %c0_i32 = arith.constant 0 : i32
    %c0_i32_0 = arith.constant 0 : i32
    return %arg1, %arg0, %c0_i32, %arg2 : i32, i32, i32, i32
  }
  func.func @transform_4(%arg0: i32, %arg1: i32, %arg2: i32) -> (i32, i32, i32, i32) {
    %c0_i32 = arith.constant 0 : i32
    %c0_i32_0 = arith.constant 0 : i32
    %c0_i32_1 = arith.constant 0 : i32
    return %arg1, %arg0, %c0_i32, %c0_i32_0 : i32, i32, i32, i32
  }
  func.func @transform_5(%arg0: i32, %arg1: i32, %arg2: i32) -> (i32, i32, i32, i32) {
    %c0_i32 = arith.constant 0 : i32
    %c0_i32_0 = arith.constant 0 : i32
    %c0_i32_1 = arith.constant 0 : i32
    return %arg1, %arg0, %c0_i32, %c0_i32_0 : i32, i32, i32, i32
  }
}

</mosaic_0001>

<bundles_post_ra>
// kernel: tpu_custom_call.1
= control target key start
LH: loop header
LB: loop body
LE: loop exit
PB: predicated region body
PF: predicated region fallthrough
CT: control target
= control target key end

     0   :  { %s1103_s0 = inlined_call_operand.vmem [shape: bf16[2,2,18,256], index: 0, kind: input, shape index: {}]   ;;  %s1104_s1 = inlined_call_operand.vmem [shape: bf16[2,4,18], index: 1, kind: input, shape index: {}]   ;;  %s1105_s2 = inlined_call_operand.vmem [shape: f32[2,4,1], index: 2, kind: input, shape index: {}]   ;;  %s1106_s3 = inlined_call_operand.hbm [shape: bf16[2,2,4,256], index: 3, kind: output, shape index: {0}]   ;;  %s1107_s4 = inlined_call_operand.vmem [shape: f32[2,2,4,1], index: 4, kind: output, shape index: {1}]   ;;  %s1108_s5 = inlined_call_operand.vmem [shape: f32[2,2,4,1], index: 5, kind: output, shape index: {2}]  }
   0x1   :  { %1112 = sst [smem:[#allocation7_spill]] %s1103_s0 }
   0x2   :  { %1113 = sst [smem:[#allocation8_spill]] %s1104_s1 }
   0x3   :  { %1114 = sst [smem:[#allocation9_spill]] %s1105_s2 }
   0x4   :  { %11 = vsyncpa [#allocation3], 0 }
   0x5   :  { %13 = vsyncpa [#allocation3 + $0x1], 0  ;;  %s935_s18 = smov 0   ;;  %s937_s19 = smov 0  }
   0x6   :  { %s939_s20 = smov 0   ;;  %s941_s21 = smov 0  }
   0x7   :  { %s943_s22 = smov 0   ;;  %s945_s23 = smov 0  }
   0x8   :  { %s947_s24 = smov 0   ;;  %s949_s25 = smov 0  }
   0x9 LB: > { %s698_s26 = sadd.s32 4294967295, %s900_s25   ;;  %s699_s27 = sadd.s32 4294967294, %s900_s25   ;;  %s900_s25 = sphi %s949_s25, %s19_s25   ;;  %s896_s24 = sphi %s947_s24, %s1131_s24   ;;  %s892_s23 = sphi %s945_s23, %s1130_s23   ;;  %s888_s22 = sphi %s943_s22, %s1129_s22   ;;  %s884_s21 = sphi %s941_s21, %s1128_s21   ;;  %s880_s20 = sphi %s939_s20, %s1127_s20   ;;  %s876_s19 = sphi %s937_s19, %s1126_s19   ;;  %s872_s18 = sphi %s935_s18, %s1125_s18  }
   0xa   : > { %s34_s28 = sadd.s32 1, %s892_s23  ;;  %s38_s29 = sadd.s32 1, %s896_s24 }
   0xb   : > { %p36_p0 = scmp.ge.s32.totalorder %s34_s28, 2  ;;  %p141_p1 = scmp.ne.s32.totalorder %s880_s20, %s876_s19 }
   0xc   : > { %p142_p2 = scmp.eq.s32.totalorder %s698_s26, 3  ;;  %p147_p5 = scmp.ne.s32.totalorder %s876_s19, %s872_s18 }
   0xd   : > { %s1133_s28 = smov (%p36_p0, %s34_s28), 0  ;;  %s1135_s29 = smov (!%p36_p0, %s38_s29), %s896_s24 }
   0xe   : > { %1115 = sst [smem:[#allocation5_spill]] %s1133_s28  ;;  %s124_s30 = ssub.s32 %s892_s23, %s1133_s28 }
   0xf   : > { %p986_p3 = por %p142_p2, %p141_p1  ;;  %p40_p4 = scmp.ge.s32.totalorder %s1135_s29, 2 }
  0x10   : > { %p148_p6 = scmp.eq.s32.totalorder %s699_s27, 3  ;;  %p702_p7 = scmp.ge.s32.totalorder %s900_s25, 1 }
  0x11   : > { %s1137_s29 = smov (%p40_p4, %s1135_s29), 0  ;;  %p253_p9 = scmp.lt.s32.totalorder %s900_s25, 5 }
  0x12   : > { %1117 = sst [smem:[#allocation6_spill]] %s1137_s29  ;;  %p995_p8 = por %p148_p6, %p147_p5 }
  0x13   : > { %s125_s8 = ssub.s32 %s896_s24, %s1137_s29  ;;  %s131_s9 = sadd.s32 1, %s880_s20 }
  0x14   : > { %s126_s10 = sor.u32 %s125_s8, %s124_s30  ;;  %p254_p10 = pnand %p702_p7, %p253_p9 }
  0x15   : > { %p129_p11 = scmp.eq.s32.totalorder %s126_s10, 0  ;;  %p314_p12 = scmp.lt.s32.totalorder (!%p254_p10), %s884_s21, 1  ;;  %v902_v0 = vmov (!%p254_p10), 0   ;;  %vm382_vm0 = vcmask (!%p254_p10), 1040384   ;;  %vm378_vm1 = vcmask (!%p254_p10), 146432   ;;  %vm448_vm2 = vcmask (!%p254_p10), 3072  }
  0x16   : > { %257 = sbr.rel (%p254_p10) target bundleno = 411 (0x19b), region = 32  ;;  %p316_p13 = scmp.lt.s32.totalorder (!%p254_p10), %s888_s22, 1  ;;  %421 = vmatprep.mubr.bf16.mxu0 (!%p254_p10), %v902_v0  ;;  %800 = vset.pattern.permute.xlu0 (!%p254_p10), %v902_v0  ;;  %v903_v9 = vmov (!%p254_p10), 0.0   ;;  %vm452_vm3 = vcmask (!%p254_p10), 1043456  }
  0x17   : > { %s1004_s11 = scalar_select %p129_p11, %s880_s20, %s131_s9  }
  0x18   : > { %s1119_s2 = sld [smem:[#allocation9_spill]] (!%p254_p10)  ;;  %s1120_s0 = sld [smem:[#allocation7_spill]] (!%p254_p10) }
  0x19   : > { %s1121_s1 = sld [smem:[#allocation8_spill]] (!%p254_p10) }
  0x1d   : > { %s1009_s12 = scalar_select %p314_p12, %s884_s21, 1 }
  0x1e   : > { %s317_s13 = scalar_select %p316_p13, %s888_s22, 1 }
  0x1f   : > { %s726_s14 = smul.u32 12, %s1009_s12 }
  0x20   : > { %s725_s15 = smul.u32 6, %s317_s13  ;;  %s706_s16 = sshll.u32 %s317_s13, 2 }
  0x21   : > { %s334_s30 = scalar_lea.vmem %s1119_s2, %s706_s16  ;;  %s705_s28 = sshll.u32 %s317_s13, 1 }
  0x22   : > { %s323_s17 = sadd.s32 %s726_s14, %s725_s15  ;;  %v357_v1 = vld [vmem:[%s334_s30] sm:$0xf]  ;;  %s330_s16 = scalar_lea.vmem %s1121_s1, %s705_s28 }
  0x23   : > { %s704_s8 = sshll.u32 %s323_s17, 2  ;;  %360 = vperm.xlu0 %800, %v357_v1   ;;  %v353_v8 = vld [vmem:[%s330_s16] sm:$0x3]  ;;  %s707_s17 = sshll.u32 %s1009_s12, 1 }
  0x24   : > { %s325_s29 = scalar_lea.vmem %s1120_s0, %s704_s8  ;;  %s1023_s26 = sadd.s32 %s707_s17, %s317_s13 }
  0x25   : > { %v356_v2 = vld [vmem:[%s325_s29 + $0x10] sm:$0x11]  ;;  %v801_v3 = vld [vmem:[%s325_s29 + $0x4] ss:$8 sps:$4 sm:$0xff]   ;;  %v804_v5 = vld [vmem:[%s325_s29] ss:$8 sps:$4 sm:$0xff]  }
  0x26   : > { %v714_v4 = vcombine.high %v356_v2, %v356_v2  ;;  %v713_v6 = vcombine.low %v356_v2, %v356_v2  ;;  %389 = vmatprep.subr.bf16.mxu0 %v801_v3  ;;  %s708_s29 = sshll.u32 %s1023_s26, 2  ;;  %s1111_s28 = sand.u32 1, %s876_s19  }
  0x27   : > { %390 = vmatpush1.bf16.msra.mxu0 %v804_v5  ;;  %s1029_s8 = scalar_lea.vmem %s1107_s4, %s708_s29  ;;  %s703_s12 = sshll.u32 %s1111_s28, 2 }
  0x28   : > { %715 = vmatprep.subr.msk.bf16.mxu0 %vm382_vm0, %v714_v4  ;;  %v384_v7 = vsel %vm382_vm0, %v713_v6, 0  ;;  %449 = vst.msk [vmem:[%s1029_s8] sm:$0xf] %vm448_vm2, %v903_v9  ;;  %s292_s13 = scalar_lea.vmem [#allocation2], %s703_s12  ;;  %s1039_s14 = scalar_lea.vmem %s1108_s5, %s708_s29 }
  0x29   : > { %450 = vst.msk [vmem:[%s1039_s14] sm:$0xf] %vm448_vm2, %v903_v9  ;;  %s720_s15 = sshll.u32 %s888_s22, 1  ;;  %s721_s16 = sshll.u32 %s884_s21, 2 }
  0x2a   : > { %s502_s17 = sadd.s32 %s721_s16, %s720_s15  ;;  %s506_s27 = sshll.u32 %s292_s13, 4  ;;  %s507_s27 = int_to_ptr.vmem [resolvable:$true] %s506_s27 }
  0x2b   : > { %392 = vmatpush1.bf16.msra.mxu0 %v384_v7  ;;  %s722_s26 = sshll.u32 %s502_s17, 5  ;;  %s1122_s0 = sand.u32 1, %s876_s19  }
  0x2c   : > { %s1048_s28 = scalar_lea.hbm %s1106_s3, %s722_s26  ;;  %s472_s1 = scalar_lea.sflag [#allocation3], %s1122_s0 }
  0x2d   : > { %s806_s2 = scalar_lea.vmem %s507_s27, 64  ;;  %s904_s29 = smov [#allocation2]  }
  0x2e   : > { %716 = vmatmul.mubr.msk.bf16.vlgmr.msra.gmra.mrb[0].mxu0 %vm378_vm1, %v353_v8  ;;  %p807_p0 = scmp.ne.s32.totalorder %s507_s27, %s806_s2  ;;  %s810_s9 = sshll.u32 %s904_s29, 4  ;;  %s811_s9 = int_to_ptr.vmem [resolvable:$false] %s810_s9 }
  0x2f   : > { %s812_s21 = scalar_lea.vmem %s811_s9, 128  ;;  %p813_p4 = scmp.lt.s32.totalorder %s507_s27, %s811_s9 }
  0x30   : > { %p808_p1 = pnand %p807_p0, %p986_p3  ;;  %p814_p5 = scmp.lt.s32.totalorder %s812_s21, %s806_s2 }
  0x32   : > { %p809_p2 = pneg %p808_p1  ;;  %p815_p6 = por %p814_p5, %p813_p4 }
  0x34   : > { %p816_p7 = pnand %p815_p6, %p809_p2 }
  0xa2   : > { %v361_v10 = vpop.permute.xlu0 %360 }
 0x101   : > { %v423_v11 = vpop.f32.mrb[0].mxu0 }
 0x102   : > { %v424_v12 = vadd.f32 %v423_v11, %v361_v10  ;;  %v425_v13 = vpop.f32.mrb[1].mxu0 }
 0x103   : > { %v426_v14 = vadd.f32 %v425_v13, %v361_v10  ;;  %v427_v15 = vpop.f32.mrb[2].mxu0 }
 0x104   : > { %v428_v16 = vpop.f32.mrb[3].mxu0  ;;  %v453_v17 = vsel %vm452_vm3, %v424_v12, 0.0  ;;  %v462_v18 = vmul.f32 %v424_v12, %v424_v12 }
 0x105   : > { %v717_v19 = vpack.c.bf16 %v426_v14, %v424_v12  ;;  %v454_v20 = vsel %vm452_vm3, %v426_v14, 0.0  ;;  %v463_v21 = vmul.f32 %v426_v14, %v426_v14 }
 0x106   : > { %v455_v22 = vadd.f32 %v454_v20, %v453_v17  ;;  %v464_v23 = vsel %vm452_vm3, %v462_v18, 0.0 }
 0x107   : > { %v465_v24 = vsel %vm452_vm3, %v463_v21, 0.0  ;;  %718 = vst.sshfl [vmem:[%s292_s13] sm:$0x33 pattern:$0x76325410] %v717_v19 }
 0x108   : > { %456 = vadd.xlane.f32.xlu0 %v455_v22  ;;  %v466_v25 = vadd.f32 %v465_v24, %v464_v23 }
 0x10a   : > { %467 = vadd.xlane.f32.xlu1 %v466_v25 }
 0x10b   : > { %819 = shalt.err (!%p816_p7)
}
 0x10c   : > { %s820_s0 = scalar_lea.hbm %s1048_s28, 64  ;;  %s824_s10 = scalar_lea.hbm %s1106_s3, 256 }
 0x10d   : > { %p821_p9 = scmp.ne.s32.totalorder %s1048_s28, %s820_s0  ;;  %p825_p12 = scmp.lt.u32.totalorder %s1048_s28, %s1106_s3 }
 0x10e   : > { %p826_p13 = scmp.lt.u32.totalorder %s824_s10, %s820_s0  ;;  %p828_p1 = scmp.lt.u32.totalorder %s820_s0, %s1048_s28 }
 0x10f   : > { %p822_p10 = pnand %p821_p9, %p986_p3 }
 0x110   : > { %p827_p0 = por %p826_p13, %p825_p12 }
 0x111   : > { %p823_p11 = pneg %p822_p10 }
 0x112   : > { %p829_p2 = por %p828_p1, %p827_p0 }
 0x114   : > { %p830_p4 = pnand %p829_p2, %p823_p11 }
 0x116   : > { %833 = shalt.err (!%p830_p4)
}
 0x117   : > { %727 = dma.vmem_to_hbm [thread:$0]  (%p986_p3), %s507_s27, 64, %s1048_s28, %s472_s1   ;;  %v451_v26 = vld [vmem:[%s1029_s8] sm:$0xf] }
 0x118   : > { %v461_v28 = vld [vmem:[%s1039_s14] sm:$0xf] }
 0x195   : > { %v457_v27 = vpop.xlane.xlu0 %456 }
 0x196   : > { %v458_v29 = vadd.f32 %v457_v27, %v451_v26 }
 0x197   : > { %v468_v30 = vpop.xlane.xlu1 %467 }
 0x198   : > { %460 = vst.msk [vmem:[%s1029_s8] sm:$0xf] %vm448_vm2, %v458_v29  ;;  %v469_v31 = vadd.f32 %v468_v30, %v461_v28 }
 0x19a   : > { %470 = vst.msk [vmem:[%s1039_s14] sm:$0xf] %vm448_vm2, %v469_v31 }
 0x19b PF: > { %p733_p5 = scmp.ge.s32.totalorder %s900_s25, 2  ;;  %s524_s2 = sand.u32 1, %s872_s18  }
 0x19c   : > { %s525_s6 = scalar_lea.sflag [#allocation3], %s524_s2 }
 0x19d   : > { %p730_p6 = pnand %p733_p5, %p995_p8 }
 0x19f   : > { %867 = dma.done.wait (!%p730_p6), %s525_s6, 64  }
 0x1a0   : > { %869 = vsyncadd (!%p730_p6), %s525_s6, 4294967232  ;;  %s19_s25 = sadd.s32 1, %s900_s25   ;;  %s1123_s1 = sld [smem:[#allocation5_spill]] }
 0x1a1   : > { %p16_p3 = scmp.ge.s32.totalorder %s19_s25, 6   ;;  %s1124_s8 = sld [smem:[#allocation6_spill]] }
 0x1a2   : > { %s1125_s18 = smov %s876_s19  ;;  %s1126_s19 = smov %s880_s20 }
 0x1a3   : > { %s1127_s20 = smov %s1004_s11  ;;  %s1128_s21 = smov %s892_s23 }
 0x1a4   : > { %s1129_s22 = smov %s896_s24  ;;  %18 = sbr.rel (!%p16_p3) target bundleno = 9 (0x9), region = 101 }
 0x1a6   : > { %s1130_s23 = smov %s1123_s1 }
 0x1a7   : > { %s1131_s24 = smov %s1124_s8 }
 0x1ab   :  { %552 = vsyncpa [#allocation3], 1 }
 0x1ac   :  { %554 = vsyncpa [#allocation3 + $0x1], 1 }

</bundles_post_ra>
